<compile_context>
chip_gen: v6e
topology: v6e:2x2x1
jax: 0.10.0
libtpu: 0.0.40
codegen_flags: <defaults>
</compile_context>

<pallas_src>
import functools
import math

import jax
import jax.numpy as jnp
import numpy as np
from jax.experimental import pallas as pl

# ----------------------------- configuration --------------------------------
N_STATE = 32
N_HEAD = 1                    # forced to 1 so the torch forward is actually runnable
H_DIM = N_STATE // N_HEAD     # 32 (even, as the rotary embedding requires)
MAX_REL_DIST = 4
BASE = 10000
SPARSITY_FACTOR = 0.5
MAX_SPAN = 4
SPAN_SCALE = 1.0              # span_scale parameter (torch init value, used via .item())
POSITIONAL_SCALING = 1.0      # positional_scaling parameter (torch init value)

BATCH = 2
SEQ = 8


def _static_span(seq_len):
    """Effective span (number of kept rows) and top-k size, both Python statics."""
    k_top = max(1, int(seq_len * SPARSITY_FACTOR))
    span = min(min(int(MAX_SPAN * SPAN_SCALE), seq_len), k_top)
    return span, k_top


# ------------------------------ Pallas kernel --------------------------------
def _fused_attn_kernel(idx_ref, q_ref, k_ref, w_ref, b_ref, cs_ref, o_ref, *, rows, d):
    """Fused: top-k row gather, q|k|v projection, RoPE, batched causal attention,
    output projection.  Everything is VMEM-resident; all shapes are static.

    Layouts (all pre-folded at init):
      w_ref  (3d,3d): rows 0:d   -> [Wq_f | 0    | 0  ]   (applied to gathered query rows)
                      rows d:2d  -> [0    | Wk_f | Wv ]   (applied to gathered key rows)
                      rows 2d:3d -> [Wo^T | 0    | 0  ]
      b_ref  (1,4d) : [bq_f | 0 | bv | bo]
      cs_ref (rows,128): [:,0:h]=cos, [:,h:2h]=sin (positional_scaling and the sdpa
                      scale h_dim**-0.25 folded in), [:,2h:2h+rows]=additive mask bias
                      (0 where same-batch & causal, -1e30 otherwise).
    """
    h = d // 2
    n_src = q_ref.shape[0]                                   # batch * seq rows

    # ---- top-k row gather as a one-hot MXU matmul (no dynamic slicing, no HBM
    # round trip for the gathered rows) ---------------------------------------
    col = jax.lax.broadcasted_iota(jnp.int32, (rows, n_src), 1)
    onehot = (col == idx_ref[...]).astype(jnp.float32)       # (rows, n_src)
    xq = jnp.dot(onehot, q_ref[...], preferred_element_type=jnp.float32)   # (rows, d)
    xk = jnp.dot(onehot, k_ref[...], preferred_element_type=jnp.float32)   # (rows, d)

    # ---- fused q | k | v projection against the packed weight slab ----------
    proj = (jnp.dot(xq, w_ref[0:d, :], preferred_element_type=jnp.float32)
            + jnp.dot(xk, w_ref[d:2 * d, :], preferred_element_type=jnp.float32)
            + b_ref[0:1, 0:3 * d])                           # (rows, 3d) = [q | k | v]

    # ---- RoPE per half (even/odd perm folded into the weights); scale folded
    # into cos/sin, so no explicit 1/sqrt(h_dim) multiply ----------------------
    cos = cs_ref[:, 0:h]
    sin = cs_ref[:, h:2 * h]
    q1 = proj[:, 0:h] * cos - proj[:, h:d] * sin
    q2 = proj[:, 0:h] * sin + proj[:, h:d] * cos
    k1 = proj[:, d:d + h] * cos - proj[:, d + h:2 * d] * sin
    k2 = proj[:, d:d + h] * sin + proj[:, d + h:2 * d] * cos
    v = proj[:, 2 * d:3 * d]

    # ---- batched causal attention; cross-batch + causal mask is a baked-in
    # additive bias constant (no iota / div / mod / select in-kernel) ----------
    dims = (((1,), (1,)), ((), ()))
    s = (jax.lax.dot_general(q1, k1, dims, preferred_element_type=jnp.float32)
         + jax.lax.dot_general(q2, k2, dims, preferred_element_type=jnp.float32)
         + cs_ref[:, 2 * h:2 * h + rows])                    # (rows, rows)
    m = jnp.max(s, axis=-1, keepdims=True)
    p = jnp.exp(s - m)
    wgt = p * pl.reciprocal(jnp.sum(p, axis=-1, keepdims=True), approx=True)
    attn = jnp.dot(wgt, v, preferred_element_type=jnp.float32)

    # ---- output projection ----------------------------------------------------
    y = (jnp.dot(attn, w_ref[2 * d:3 * d, 0:d], preferred_element_type=jnp.float32)
         + b_ref[0:1, 3 * d:4 * d])
    o_ref[...] = y.astype(o_ref.dtype)


def fused_sparse_span_attention(flat_idx, q_flat, k_flat, w_slab, bias_row, cs_slab,
                                *, rows, d):
    kernel = functools.partial(_fused_attn_kernel, rows=rows, d=d)
    operands = (flat_idx, q_flat, k_flat, w_slab, bias_row, cs_slab)
    n_src = q_flat.shape[0]
    cost = pl.CostEstimate(
        flops=int(2 * rows * n_src * d * 2        # one-hot gathers
                  + 2 * rows * d * (3 * d) * 2    # fused q|k|v projection (two halves)
                  + 2 * rows * rows * d           # scores
                  + 2 * rows * rows * d           # attn @ v
                  + 2 * rows * d * d),            # output projection
        transcendentals=int(rows * rows + rows),
        bytes_accessed=int(sum(int(a.size) * a.dtype.itemsize for a in operands)
                           + rows * d * 4))
    # Gridless call: full-array refs, no pipelining machinery, no double buffering;
    # everything lives in VMEM for the single kernel body.  If batch*span ever grows,
    # reintroduce a leading "parallel" rows axis (multiples of 8) sized against the
    # target chip's VMEM (64 MiB on v7x vs 128 MiB on v5e/v6e).
    return pl.pallas_call(
        kernel,
        out_shape=jax.ShapeDtypeStruct((rows, d), jnp.float32),
        cost_estimate=cost,
    )(*operands)


# ------------------------------- JAX glue -------------------------------------
def combined_sparse_adaptive_attention(params, query, key, value):
    # `value` only plays the role of the (always non-None) mask in MultiheadAttention;
    # it never reaches the numerics (V is computed from key_span).
    del value
    b, s, d = query.shape
    span, k_top = _static_span(s)
    rows = b * span

    # TODO(synk): top-k row selection stays in XLA glue (no Pallas TPU top-k
    # primitive); the gather itself is done in-kernel from these indices.
    norms = jnp.sum(query * query, axis=-1)                 # monotone in L2 norm
    _, idx = jax.lax.top_k(norms, k_top)                    # descending, like torch.topk
    idx = idx[:, :span]                                     # [:span_length] slice
    flat_idx = (idx.astype(jnp.int32)
                + (jnp.arange(b, dtype=jnp.int32) * s)[:, None]).reshape(rows, 1)

    out = fused_sparse_span_attention(
        flat_idx, query.reshape(b * s, d), key.reshape(b * s, d),
        params["w_slab"], params["bias_row"], params["cs_slab"], rows=rows, d=d)
    attn_output = out.reshape(b, span, d)

    # attn_weights == 0 + rel_pos_bias[positions]: precomputed once at init.
    return attn_output, params["attn_weights"]


# --------------------------- parameter construction ---------------------------
def _givens_product(thetas, theta_scale, rotation_pairs, rotation_matrix,
                    num_rotations_scale, h_dim, num_rotations):
    """Fold of CombinedRotaryEmbedding's python loop: x <- x @ G_0 @ ... @ rotation_matrix."""
    adjusted = int(num_rotations * float(num_rotations_scale))
    r = np.eye(h_dim, dtype=np.float32)
    for kk in range(adjusted):
        i = int(rotation_pairs[kk, 0])
        j = int(rotation_pairs[kk, 1])
        theta = float(thetas[kk]) * float(theta_scale)
        g = np.eye(h_dim, dtype=np.float32)
        g[i, i] = math.cos(theta)
        g[i, j] = -math.sin(theta)
        g[j, i] = math.sin(theta)
        g[j, j] = math.cos(theta)
        r = r @ g
    return (r @ rotation_matrix).astype(np.float32)


def init_params(key):
    ks = jax.random.split(key, 8)

    def randw(k, shape, scale=0.08):
        return scale * jax.random.normal(k, shape, dtype=jnp.float32)

    # torch-layout weights (out, in): y = x @ W^T + b.  Key projection has no bias.
    wq = randw(ks[0], (N_STATE, N_STATE)); bq = randw(ks[1], (N_STATE,))
    wk = randw(ks[2], (N_STATE, N_STATE))
    wv = randw(ks[3], (N_STATE, N_STATE)); bv = randw(ks[4], (N_STATE,))
    wo = randw(ks[5], (N_STATE, N_STATE)); bo = randw(ks[6], (N_STATE,))
    rel_pos_bias = randw(ks[7], (2 * MAX_REL_DIST - 1, N_HEAD), 0.05)

    # CombinedRotaryEmbedding parameters at torch defaults (thetas=0 -> identity fold).
    num_rot = H_DIM // 2
    thetas = np.zeros((num_rot,), np.float32)
    rotation_pairs = np.random.RandomState(0).rand(num_rot, 2) * H_DIM
    rotation_matrix = np.eye(H_DIM, dtype=np.float32)
    r_head = _givens_product(thetas, 1.0, rotation_pairs, rotation_matrix, 1.0,
                             H_DIM, num_rot)
    rot = np.kron(np.eye(N_HEAD, dtype=np.float32), r_head)   # per-head right-mult

    # even/odd channel permutation folded into the q/k weights (per head).
    perm_h = np.concatenate([np.arange(0, H_DIM, 2), np.arange(1, H_DIM, 2)])
    perm = np.concatenate([perm_h + hh * H_DIM for hh in range(N_HEAD)])

    wq_np, bq_np = np.asarray(wq), np.asarray(bq)
    wk_np = np.asarray(wk)
    wv_np, bv_np = np.asarray(wv), np.asarray(bv)
    wo_np, bo_np = np.asarray(wo), np.asarray(bo)

    wq_f = (wq_np.T @ rot)[:, perm]                          # (D, D)
    bq_f = (bq_np @ rot)[perm]                               # bias goes through the rotation too
    wk_f = (wk_np.T @ rot)[:, perm]

    d = N_STATE
    w_slab = np.zeros((3 * d, 3 * d), np.float32)
    w_slab[0:d, 0:d] = wq_f
    w_slab[d:2 * d, d:2 * d] = wk_f
    w_slab[d:2 * d, 2 * d:3 * d] = wv_np.T
    w_slab[2 * d:3 * d, 0:d] = wo_np.T

    bias_row = np.zeros((1, 4 * d), np.float32)
    bias_row[0, 0:d] = bq_f
    bias_row[0, 2 * d:3 * d] = bv_np
    bias_row[0, 3 * d:4 * d] = bo_np

    # Static per-call constants (span/batch are compile-time): cos/sin with the sdpa
    # scale (h_dim**-0.25 on both q and k) and positional_scaling folded in, plus the
    # cross-batch + causal additive mask bias.
    span, _ = _static_span(SEQ)
    rows = BATCH * span
    half = d // 2
    inv_freq = 1.0 / (BASE ** (np.arange(0, H_DIM, 2, dtype=np.float32) / H_DIM))
    ang = np.arange(span, dtype=np.float32)[:, None] * inv_freq[None, :]   # (span, half)
    qk_scale = float(H_DIM) ** -0.25
    cos_h = np.tile(np.cos(ang), (BATCH, 1)) * POSITIONAL_SCALING * qk_scale
    sin_h = np.tile(np.sin(ang), (BATCH, 1)) * POSITIONAL_SCALING * qk_scale
    ri = np.arange(rows)[:, None]
    ci = np.arange(rows)[None, :]
    keep = ((ri // span) == (ci // span)) & ((ci % span) <= (ri % span))
    mask_bias = np.where(keep, np.float32(0.0), np.float32(-1e30)).astype(np.float32)

    cs_width = 128
    assert 2 * half + rows <= cs_width, "cos/sin/mask slab overflows its 128 lanes"
    cs_slab = np.zeros((rows, cs_width), np.float32)
    cs_slab[:, 0:half] = cos_h
    cs_slab[:, half:2 * half] = sin_h
    cs_slab[:, 2 * half:2 * half + rows] = mask_bias

    # attn_weights == rel_pos_bias[positions] permuted — input-independent, so baked.
    pos = np.arange(span)[:, None] - np.arange(span)[None, :]
    pos = np.clip(pos, -(MAX_REL_DIST - 1), MAX_REL_DIST - 1) + MAX_REL_DIST - 1
    rel = np.asarray(rel_pos_bias)[pos]                      # (span, span, n_head)
    attn_weights = jnp.asarray(np.transpose(rel, (2, 0, 1))[None])  # (1, n_head, span, span)

    return {
        # packed constants consumed by the fused Pallas kernel
        "w_slab": jnp.asarray(w_slab),
        "bias_row": jnp.asarray(bias_row),
        "cs_slab": jnp.asarray(cs_slab),
        "attn_weights": attn_weights,
        # raw / unfolded params kept only for the pure-JAX reference check
        "inv_freq": jnp.asarray(inv_freq, jnp.float32),
        "positional_scaling": jnp.float32(POSITIONAL_SCALING),
        "rel_pos_bias": rel_pos_bias,
        "raw": {"wq": wq, "bq": bq, "wk": wk, "wv": wv, "bv": bv,
                "wo": wo, "bo": bo, "rot": jnp.asarray(rot)},
    }


# --------------------------- pure-JAX reference -------------------------------
def sparse_span_select(query, key):
    """Top-k row selection by query L2 norm + span slicing (reference path)."""
    b, s, d = query.shape
    span, k_top = _static_span(s)
    norms = jnp.sum(query * query, axis=-1)
    _, idx = jax.lax.top_k(norms, k_top)
    q_sp = jnp.take_along_axis(query, idx[..., None], axis=1)
    k_sp = jnp.take_along_axis(key, idx[..., None], axis=1)
    return q_sp[:, :span], k_sp[:, :span], span


def reference_forward(params, query, key, value):
    """Literal (unfused) re-statement of the torch forward, for a numerics check."""
    del value
    q_span, k_span, span = sparse_span_select(query, key)
    b, _, d = q_span.shape
    r = params["raw"]
    q = q_span @ r["wq"].T + r["bq"]
    k = k_span @ r["wk"].T
    v = k_span @ r["wv"].T + r["bv"]

    def rotary(x):
        xr = (x.reshape(-1, H_DIM) @ r["rot"]).reshape(b, span, N_HEAD, H_DIM)
        t = jnp.arange(span, dtype=jnp.float32)
        ang = t[:, None] * params["inv_freq"][None, :]
        sin = jnp.sin(ang)[None, :, None, :]
        cos = jnp.cos(ang)[None, :, None, :]
        x1 = xr[..., 0::2]
        x2 = xr[..., 1::2]
        out = jnp.concatenate([x1 * cos - x2 * sin, x1 * sin + x2 * cos], axis=-1)
        return out.reshape(b, span, d)

    q = rotary(q) * params["positional_scaling"]
    k = rotary(k) * params["positional_scaling"]
    qh = q.reshape(b, span, N_HEAD, H_DIM).transpose(0, 2, 1, 3)
    kh = k.reshape(b, span, N_HEAD, H_DIM).transpose(0, 2, 1, 3)
    vh = v.reshape(b, span, N_HEAD, H_DIM).transpose(0, 2, 1, 3)
    s = jnp.einsum("bhqd,bhkd->bhqk", qh, kh) / math.sqrt(H_DIM)
    if span > 1:                                # is_causal = mask is not None and n_ctx > 1
        causal = jnp.tril(jnp.ones((span, span), bool))
        s = jnp.where(causal, s, -jnp.inf)
    w = jax.nn.softmax(s, axis=-1)
    o = jnp.einsum("bhqk,bhkd->bhqd", w, vh).transpose(0, 2, 1, 3).reshape(b, span, d)
    attn_output = o @ r["wo"].T + r["bo"]
    pos = np.arange(span)[:, None] - np.arange(span)[None, :]
    pos = np.clip(pos, -(MAX_REL_DIST - 1), MAX_REL_DIST - 1) + MAX_REL_DIST - 1
    attn_weights = jnp.transpose(params["rel_pos_bias"][pos], (2, 0, 1))[None]
    return attn_output, attn_weights


# ----------------------------------- main --------------------------------------
if __name__ == "__main__":
    root = jax.random.PRNGKey(0)
    pkey, qkey, kkey, vkey = jax.random.split(root, 4)
    params = init_params(pkey)
    query = jax.random.normal(qkey, (BATCH, SEQ, N_STATE), dtype=jnp.float32)
    key_in = jax.random.normal(kkey, (BATCH, SEQ, N_STATE), dtype=jnp.float32)
    value_in = jax.random.normal(vkey, (BATCH, SEQ, N_STATE), dtype=jnp.float32)

    fwd = jax.jit(combined_sparse_adaptive_attention)
    attn_output, attn_weights = jax.block_until_ready(fwd(params, query, key_in, value_in))

    span, _ = _static_span(SEQ)
    assert attn_output.shape == (BATCH, span, N_STATE)
    assert attn_weights.shape == (1, N_HEAD, span, span)
    assert bool(jnp.all(jnp.isfinite(attn_output)))

    ref_out, ref_w = reference_forward(params, query, key_in, value_in)
    # tolerance allows for the approximate EUP reciprocal in the softmax denominator
    assert bool(jnp.allclose(attn_output, ref_out, atol=5e-3, rtol=5e-3)), (
        "max abs err = %g" % float(jnp.max(jnp.abs(attn_output - ref_out))))
    assert bool(jnp.allclose(attn_weights, ref_w, atol=1e-6))

    print("KERNEL_OK")
</pallas_src>

<mosaic_0001>
module attributes {stable_mosaic.version = 11 : i64} {
  func.func @_fused_attn_kernel(%arg0: memref<8x1xi32, #tpu.memory_space<vmem>>, %arg1: memref<16x32xf32, #tpu.memory_space<vmem>>, %arg2: memref<16x32xf32, #tpu.memory_space<vmem>>, %arg3: memref<96x96xf32, #tpu.memory_space<vmem>>, %arg4: memref<1x128xf32, #tpu.memory_space<vmem>>, %arg5: memref<8x128xf32, #tpu.memory_space<vmem>>, %arg6: memref<8x32xf32, #tpu.memory_space<vmem>>) attributes {dimension_semantics = [], scalar_prefetch = 0 : i64, scratch_operands = 0 : i64, tpu.core_type = #tpu.core_type<tc>} {
    %0 = tpu.iota {dimensions = array<i32: 1>} : vector<8x16xi32>
    %c0 = arith.constant 0 : index
    %c0_0 = arith.constant 0 : index
    %1 = vector.load %arg0[%c0, %c0_0] : memref<8x1xi32, #tpu.memory_space<vmem>>, vector<8x1xi32>
    %2 = vector.broadcast %1 : vector<8x1xi32> to vector<8x16xi32>
    %3 = arith.cmpi eq, %0, %2 : vector<8x16xi32>
    %4 = arith.extui %3 : vector<8x16xi1> to vector<8x16xi32>
    %5 = arith.sitofp %4 : vector<8x16xi32> to vector<8x16xf32>
    %c0_1 = arith.constant 0 : index
    %c0_2 = arith.constant 0 : index
    %6 = vector.load %arg1[%c0_1, %c0_2] : memref<16x32xf32, #tpu.memory_space<vmem>>, vector<16x32xf32>
    %cst = arith.constant dense<0.000000e+00> : vector<8x32xf32>
    %7 = tpu.matmul %5, %6, %cst {dimension_numbers = #tpu.dot_dimension_numbers<[1], [0], [0], [1], [0, 0, 1, 1], [], []>} : vector<8x16xf32>, vector<16x32xf32>, vector<8x32xf32> -> vector<8x32xf32>
    %c0_3 = arith.constant 0 : index
    %c0_4 = arith.constant 0 : index
    %8 = vector.load %arg2[%c0_3, %c0_4] : memref<16x32xf32, #tpu.memory_space<vmem>>, vector<16x32xf32>
    %cst_5 = arith.constant dense<0.000000e+00> : vector<8x32xf32>
    %9 = tpu.matmul %5, %8, %cst_5 {dimension_numbers = #tpu.dot_dimension_numbers<[1], [0], [0], [1], [0, 0, 1, 1], [], []>} : vector<8x16xf32>, vector<16x32xf32>, vector<8x32xf32> -> vector<8x32xf32>
    %c0_6 = arith.constant 0 : index
    %c0_7 = arith.constant 0 : index
    %10 = vector.load %arg3[%c0_6, %c0_7] : memref<96x96xf32, #tpu.memory_space<vmem>>, vector<32x96xf32>
    %cst_8 = arith.constant dense<0.000000e+00> : vector<8x96xf32>
    %11 = tpu.matmul %7, %10, %cst_8 {dimension_numbers = #tpu.dot_dimension_numbers<[1], [0], [0], [1], [0, 0, 1, 1], [], []>} : vector<8x32xf32>, vector<32x96xf32>, vector<8x96xf32> -> vector<8x96xf32>
    %c32 = arith.constant 32 : index
    %c0_9 = arith.constant 0 : index
    %12 = vector.load %arg3[%c32, %c0_9] : memref<96x96xf32, #tpu.memory_space<vmem>>, vector<32x96xf32>
    %cst_10 = arith.constant dense<0.000000e+00> : vector<8x96xf32>
    %13 = tpu.matmul %9, %12, %cst_10 {dimension_numbers = #tpu.dot_dimension_numbers<[1], [0], [0], [1], [0, 0, 1, 1], [], []>} : vector<8x32xf32>, vector<32x96xf32>, vector<8x96xf32> -> vector<8x96xf32>
    %14 = arith.addf %11, %13 : vector<8x96xf32>
    %c0_11 = arith.constant 0 : index
    %c0_12 = arith.constant 0 : index
    %15 = vector.load %arg4[%c0_11, %c0_12] : memref<1x128xf32, #tpu.memory_space<vmem>>, vector<1x96xf32>
    %16 = vector.broadcast %15 : vector<1x96xf32> to vector<8x96xf32>
    %17 = arith.addf %14, %16 : vector<8x96xf32>
    %c0_13 = arith.constant 0 : index
    %c0_14 = arith.constant 0 : index
    %18 = vector.load %arg5[%c0_13, %c0_14] : memref<8x128xf32, #tpu.memory_space<vmem>>, vector<8x16xf32>
    %c0_15 = arith.constant 0 : index
    %c16 = arith.constant 16 : index
    %19 = vector.load %arg5[%c0_15, %c16] : memref<8x128xf32, #tpu.memory_space<vmem>>, vector<8x16xf32>
    %20 = vector.extract_strided_slice %17 {offsets = [0, 0], sizes = [8, 16], strides = [1, 1]} : vector<8x96xf32> to vector<8x16xf32>
    %21 = arith.mulf %20, %18 : vector<8x16xf32>
    %22 = vector.extract_strided_slice %17 {offsets = [0, 16], sizes = [8, 16], strides = [1, 1]} : vector<8x96xf32> to vector<8x16xf32>
    %23 = arith.mulf %22, %19 : vector<8x16xf32>
    %24 = arith.subf %21, %23 : vector<8x16xf32>
    %25 = vector.extract_strided_slice %17 {offsets = [0, 0], sizes = [8, 16], strides = [1, 1]} : vector<8x96xf32> to vector<8x16xf32>
    %26 = arith.mulf %25, %19 : vector<8x16xf32>
    %27 = vector.extract_strided_slice %17 {offsets = [0, 16], sizes = [8, 16], strides = [1, 1]} : vector<8x96xf32> to vector<8x16xf32>
    %28 = arith.mulf %27, %18 : vector<8x16xf32>
    %29 = arith.addf %26, %28 : vector<8x16xf32>
    %30 = vector.extract_strided_slice %17 {offsets = [0, 32], sizes = [8, 16], strides = [1, 1]} : vector<8x96xf32> to vector<8x16xf32>
    %31 = arith.mulf %30, %18 : vector<8x16xf32>
    %32 = vector.extract_strided_slice %17 {offsets = [0, 48], sizes = [8, 16], strides = [1, 1]} : vector<8x96xf32> to vector<8x16xf32>
    %33 = arith.mulf %32, %19 : vector<8x16xf32>
    %34 = arith.subf %31, %33 : vector<8x16xf32>
    %35 = vector.extract_strided_slice %17 {offsets = [0, 32], sizes = [8, 16], strides = [1, 1]} : vector<8x96xf32> to vector<8x16xf32>
    %36 = arith.mulf %35, %19 : vector<8x16xf32>
    %37 = vector.extract_strided_slice %17 {offsets = [0, 48], sizes = [8, 16], strides = [1, 1]} : vector<8x96xf32> to vector<8x16xf32>
    %38 = arith.mulf %37, %18 : vector<8x16xf32>
    %39 = arith.addf %36, %38 : vector<8x16xf32>
    %40 = vector.extract_strided_slice %17 {offsets = [0, 64], sizes = [8, 32], strides = [1, 1]} : vector<8x96xf32> to vector<8x32xf32>
    %cst_16 = arith.constant dense<0.000000e+00> : vector<8x8xf32>
    %41 = tpu.matmul %24, %34, %cst_16 {dimension_numbers = #tpu.dot_dimension_numbers<[1], [1], [0], [0], [0, 0, 1, 0], [], []>} : vector<8x16xf32>, vector<8x16xf32>, vector<8x8xf32> -> vector<8x8xf32>
    %cst_17 = arith.constant dense<0.000000e+00> : vector<8x8xf32>
    %42 = tpu.matmul %29, %39, %cst_17 {dimension_numbers = #tpu.dot_dimension_numbers<[1], [1], [0], [0], [0, 0, 1, 0], [], []>} : vector<8x16xf32>, vector<8x16xf32>, vector<8x8xf32> -> vector<8x8xf32>
    %43 = arith.addf %41, %42 : vector<8x8xf32>
    %c0_18 = arith.constant 0 : index
    %c32_19 = arith.constant 32 : index
    %44 = vector.load %arg5[%c0_18, %c32_19] : memref<8x128xf32, #tpu.memory_space<vmem>>, vector<8x8xf32>
    %45 = arith.addf %43, %44 : vector<8x8xf32>
    %cst_20 = arith.constant dense<0xFF800000> : vector<8xf32>
    %46 = vector.multi_reduction <maximumf>, %45, %cst_20 [1] : vector<8x8xf32> to vector<8xf32>
    %47 = vector.shape_cast %46 : vector<8xf32> to vector<8x1xf32>
    %48 = vector.broadcast %47 : vector<8x1xf32> to vector<8x8xf32>
    %49 = arith.subf %45, %48 : vector<8x8xf32>
    %50 = math.exp %49 : vector<8x8xf32>
    %cst_21 = arith.constant dense<0.000000e+00> : vector<8xf32>
    %51 = vector.multi_reduction <add>, %50, %cst_21 [1] : vector<8x8xf32> to vector<8xf32>
    %52 = vector.shape_cast %51 : vector<8xf32> to vector<8x1xf32>
    %53 = tpu.reciprocal %52 {approx = true} : vector<8x1xf32> -> vector<8x1xf32>
    %54 = vector.broadcast %53 : vector<8x1xf32> to vector<8x8xf32>
    %55 = arith.mulf %50, %54 : vector<8x8xf32>
    %cst_22 = arith.constant dense<0.000000e+00> : vector<8x32xf32>
    %56 = tpu.matmul %55, %40, %cst_22 {dimension_numbers = #tpu.dot_dimension_numbers<[1], [0], [0], [1], [0, 0, 1, 1], [], []>} : vector<8x8xf32>, vector<8x32xf32>, vector<8x32xf32> -> vector<8x32xf32>
    %c64 = arith.constant 64 : index
    %c0_23 = arith.constant 0 : index
    %57 = vector.load %arg3[%c64, %c0_23] : memref<96x96xf32, #tpu.memory_space<vmem>>, vector<32x32xf32>
    %cst_24 = arith.constant dense<0.000000e+00> : vector<8x32xf32>
    %58 = tpu.matmul %56, %57, %cst_24 {dimension_numbers = #tpu.dot_dimension_numbers<[1], [0], [0], [1], [0, 0, 1, 1], [], []>} : vector<8x32xf32>, vector<32x32xf32>, vector<8x32xf32> -> vector<8x32xf32>
    %c0_25 = arith.constant 0 : index
    %c96 = arith.constant 96 : index
    %59 = vector.load %arg4[%c0_25, %c96] : memref<1x128xf32, #tpu.memory_space<vmem>>, vector<1x32xf32>
    %60 = vector.broadcast %59 : vector<1x32xf32> to vector<8x32xf32>
    %61 = arith.addf %58, %60 : vector<8x32xf32>
    %c0_26 = arith.constant 0 : index
    %c0_27 = arith.constant 0 : index
    %62 = vector.load %arg6[%c0_26, %c0_27] : memref<8x32xf32, #tpu.memory_space<vmem>>, vector<8x32xf32>
    tpu.vector_store %arg6[%c0_26, %c0_27], %61 {strides = array<i32>} : memref<8x32xf32, #tpu.memory_space<vmem>>, vector<8x32xf32>,
    return
  }
}

</mosaic_0001>

<bundles_post_ra>
// kernel: combined_sparse_adaptive_attention.1
= control target key start
LH: loop header
LB: loop body
LE: loop exit
PB: predicated region body
PF: predicated region fallthrough
CT: control target
= control target key end

     0   :  { %11 = vsyncpa [#allocation3], 0  ;;  %s1031_s0 = inlined_call_operand.vmem [shape: s32[8,1], index: 0, kind: input, shape index: {}]   ;;  %s1032_s1 = inlined_call_operand.vmem [shape: f32[16,32], index: 1, kind: input, shape index: {}]   ;;  %s1033_s2 = inlined_call_operand.vmem [shape: f32[16,32], index: 2, kind: input, shape index: {}]   ;;  %s1034_s3 = inlined_call_operand.hbm [shape: f32[96,96], index: 3, kind: input, shape index: {}]   ;;  %s1035_s4 = inlined_call_operand.vmem [shape: f32[1,128], index: 4, kind: input, shape index: {}]   ;;  %s1036_s5 = inlined_call_operand.vmem [shape: f32[8,128], index: 5, kind: input, shape index: {}]   ;;  %s1037_s6 = inlined_call_operand.hbm [shape: f32[8,32], index: 6, kind: output, shape index: {}]  }
   0x1   :  { %12 = vsyncpa [#allocation4], 0  ;;  %s905_s21 = smov [#allocation2]  }
   0x2   :  { %s24_s22 = sshll.u32 %s905_s21, 4  ;;  %s25_s22 = int_to_ptr.vmem [resolvable:$true] %s24_s22 }
   0x3   :  { %s869_s23 = scalar_lea.vmem %s25_s22, 1536  ;;  %p874_p1 = scmp.lt.s32.totalorder %s25_s22, %s25_s22 }
   0x4   :  { %p870_p0 = scmp.ne.s32.totalorder %s25_s22, %s869_s23  ;;  %p875_p2 = scmp.lt.s32.totalorder %s869_s23, %s869_s23 }
   0x6   :  { %p876_p3 = por %p875_p2, %p874_p1 }
   0x8   :  { %p877_p4 = pnand %p876_p3, %p870_p0 }
   0xa   :  { %880 = shalt.err (!%p877_p4)
}
   0xb   :  { %s906_s24 = smov 128   ;;  %s907_s25 = smov 8  }
   0xc   :  { %30 = dma.hbm_to_vmem [thread:$0]  %s1034_s3, 1536, %s25_s22, [#allocation3], %s906_s24, %s906_s24, %s907_s25  }
   0xd   :  { %901 = dma.done.wait [#allocation3], 1536  }
   0xe   :  { %902 = vsyncadd [#allocation3], 4294965760  ;;  %v908_v0 = vmov 0   ;;  %v909_v1 = vmov 0.0   ;;  %vm910_vm0 = vmmov 0   ;;  %v40_v2 = vld [vmem:[%s1031_s0] sm:$0xff]  ;;  %v38_v7 = vlaneseq }
   0xf   :  { %856 = vset.pattern.permute.xlu0 %v908_v0  ;;  %781 = vmatprep.subr.mxu0 %v909_v1  ;;  %v48_v3 = vld [vmem:[%s1032_s1 + $0x8] sm:$0xff]  ;;  %v47_v5 = vld [vmem:[%s1032_s1] sm:$0xff]  ;;  %vm49_vm1 = vcmask 130048   ;;  %v202_v10 = vld [vmem:[#allocation2 + $0x38] sm:$0xff]  ;;  %s912_s13 = smov 32   ;;  %s913_s14 = smov 16  }
  0x10   :  { %788 = vmatprep.subr.mxu1 %v909_v1  ;;  %785 = vmatprep.mubr.msk.f32.mxu0 %vm910_vm0, %v909_v1  ;;  %v124_v4 = vld [vmem:[%s1033_s2 + $0x8] sm:$0xff]  ;;  %v123_v6 = vld [vmem:[%s1033_s2] sm:$0xff]  ;;  %v39_v8 = vand.u32 127, %v38_v7  ;;  %v198_v11 = vld [vmem:[#allocation2 + $0x18] sm:$0xff]  ;;  %s911_s2 = smov 48   ;;  %vm203_vm3 = vcmask 261120  }
  0x11   :  { %792 = vmatprep.mubr.msk.f32.mxu1 %vm910_vm0, %v909_v1  ;;  %42 = vperm.xlu0 %856, %v40_v2   ;;  %v201_v13 = vld [vmem:[#allocation2 + $0x30] sm:$0xff]  ;;  %v200_v15 = vld [vmem:[#allocation2 + $0x28] sm:$0xff]  ;;  %v199_v17 = vld [vmem:[#allocation2 + $0x20] sm:$0xff]  ;;  %s914_s16 = smov 112   ;;  %s915_s17 = smov 96   ;;  %vm557_vm4 = vcmask 64512  }
  0x12   :  { %782 = vmatpush3.msra.mxu0 %v48_v3  ;;  %789 = vmatpush3.msra.mxu1 %v124_v4  ;;  %v197_v14 = vld [vmem:[#allocation2 + $0x10] sm:$0xff]  ;;  %v196_v16 = vld [vmem:[#allocation2 + $0x8] sm:$0xff]  ;;  %v195_v18 = vld [vmem:[#allocation2] sm:$0xff]  ;;  %s917_s18 = smov [#allocation5]  }
  0x13   :  { %783 = vmatprep.subr.mxu0 %v909_v1  ;;  %790 = vmatprep.subr.mxu1 %v909_v1  ;;  %v358_v19 = vld [vmem:[%s1036_s5] sm:$0xff]  ;;  %v649_v0 = vld [vmem:[#allocation2 + $0x58] sm:$0xff]  ;;  %v648_v2 = vld [vmem:[#allocation2 + $0x50] sm:$0xff]  ;;  %s733_s19 = sshll.u32 %s917_s18, 4  ;;  %s734_s19 = int_to_ptr.vmem [resolvable:$true] %s733_s19 }
  0x14   :  { %784 = vmatpush3.msra.mxu0 %v47_v5  ;;  %791 = vmatpush3.msra.mxu1 %v123_v6  ;;  %v747_v26 = vld [vmem:[%s1035_s4] ss:$0 sm:$0xff]  ;;  %s916_s4 = smov 64   ;;  %v647_v3 = vld [vmem:[#allocation2 + $0x48] sm:$0xff]  ;;  %s881_s20 = scalar_lea.vmem %s734_s19, 128 }
  0x15   :  { %795 = vmatprep.subr.mxu0 %v909_v1  ;;  %806 = vmatprep.subr.mxu1 %v909_v1  ;;  %v646_v7 = vld [vmem:[#allocation2 + $0x40] sm:$0xff]  ;;  %p882_p5 = scmp.ne.s32.totalorder %s734_s19, %s881_s20  ;;  %p886_p6 = scmp.lt.s32.totalorder %s734_s19, %s734_s19 }
  0x16   :  { %388 = vrot.lane.b32.xlu1 %v358_v19, %s911_s2  ;;  %379 = vrot.lane.b32.xlu0 %v358_v19, %s912_s13  ;;  %p887_p7 = scmp.lt.s32.totalorder %s881_s20, %s881_s20 }
  0x18   :  { %p888_p8 = por %p887_p7, %p886_p6 }
  0x1a   :  { %370 = vrot.lane.b32.xlu1 %v358_v19, %s913_s14  ;;  %p889_p9 = pnand %p888_p8, %p882_p5 }
  0x88   :  { %v389_v32 = vpop.permute.xlu1 %388 }
  0x8c   :  { %v43_v9 = vpop.permute.xlu0 %42  ;;  %v371_v35 = vpop.permute.xlu1 %370 }
  0x8d   :  { %vm44_vm2 = vcmp.eq.s32.totalorder %v39_v8, %v43_v9 }
  0x8e   :  { %v742_v12 = vsel %vm44_vm2, 1.0, %v909_v1 }
  0x8f   :  { %786 = vmatmul.mubr.msk.f32.vlgmr.msra.gmra.mxu0 %vm49_vm1, %v742_v12  ;;  %793 = vmatmul.mubr.msk.f32.vlgmr.msra.gmra.mxu1 %vm49_vm1, %v742_v12 }
  0x90   :  { %796 = vmatpush3.msra.mxu0 %v202_v10  ;;  %807 = vmatpush3.msra.mxu1 %v198_v11  ;;  %v380_v28 = vpop.permute.xlu0 %379 }
  0x91   :  { %797 = vmatprep.subr.mxu0 %v909_v1  ;;  %808 = vmatprep.subr.mxu1 %v909_v1 }
  0x92   :  { %798 = vmatpush3.msra.mxu0 %v201_v13  ;;  %809 = vmatpush3.msra.mxu1 %v197_v14 }
  0x93   :  { %799 = vmatprep.subr.mxu0 %v909_v1  ;;  %810 = vmatprep.subr.mxu1 %v909_v1 }
  0x94   :  { %800 = vmatpush3.msra.mxu0 %v200_v15  ;;  %811 = vmatpush3.msra.mxu1 %v196_v16 }
  0x95   :  { %801 = vmatprep.subr.mxu0 %v909_v1  ;;  %812 = vmatprep.subr.mxu1 %v909_v1 }
  0x96   :  { %803 = vmatprep.mubr.msk.f32.mxu0 %vm910_vm0, %v909_v1  ;;  %814 = vmatprep.mubr.msk.f32.mxu1 %vm910_vm0, %v909_v1 }
  0x97   :  { %802 = vmatpush3.msra.mxu0 %v199_v17  ;;  %813 = vmatpush3.msra.mxu1 %v195_v18 }
  0x98   :  { %817 = vmatprep.subr.mxu0 %v909_v1  ;;  %822 = vmatprep.subr.mxu1 %v909_v1 }
 0x14f   :  { %v119_v20 = vpop.f32.mrf.mxu0  ;;  %v191_v21 = vpop.f32.mrf.mxu1 }
 0x150   :  { %804 = vmatmul.mubr.msk.f32.vlgmr.msra.gmra.mxu0 %vm203_vm3, %v191_v21  ;;  %815 = vmatmul.mubr.msk.f32.vlgmr.msra.gmra.mxu1 %vm203_vm3, %v119_v20 }
 0x151   :  { %v787_v22 = vpop.f32.mrf.mxu0  ;;  %v794_v23 = vpop.f32.mrf.mxu1  ;;  %819 = vmatprep.mubr.msk.f32.mxu0 %vm910_vm0, %v909_v1  ;;  %824 = vmatprep.mubr.msk.f32.mxu1 %vm910_vm0, %v909_v1 }
 0x210   :  { %v273_v24 = vpop.f32.mrf.mxu0  ;;  %v346_v25 = vpop.f32.mrf.mxu1 }
 0x211   :  { %v347_v27 = vadd.f32 %v346_v25, %v273_v24 }
 0x212   :  { %v805_v29 = vpop.f32.mrf.mxu0  ;;  %v816_v30 = vpop.f32.mrf.mxu1 }
 0x213   :  { %v357_v31 = vadd.f32 %v747_v26, %v347_v27 }
 0x215   :  { %v382_v33 = vmul.f32 %v380_v28, %v357_v31  ;;  %v391_v34 = vmul.f32 %v389_v32, %v357_v31  ;;  %v373_v36 = vmul.f32 %v371_v35, %v357_v31  ;;  %v359_v41 = vmul.f32 %v358_v19, %v357_v31 }
 0x217   :  { %393 = vrot.lane.b32.xlu1 %v391_v34, %s914_s16  ;;  %384 = vrot.lane.b32.xlu0 %v382_v33, %s914_s16 }
 0x21b   :  { %366 = vrot.lane.b32.xlu0 %v358_v19, %s914_s16 }
 0x289   :  { %v394_v37 = vpop.permute.xlu1 %393  ;;  %v385_v38 = vpop.permute.xlu0 %384 }
 0x28a   :  { %v396_v39 = vadd.f32 %v394_v37, %v373_v36  ;;  %v387_v40 = vsub.f32 %v382_v33, %v385_v38 }
 0x28c   :  { %398 = vrot.lane.b32.xlu1 %v396_v39, %s915_s17  ;;  %476 = vrot.lane.b32.xlu0 %v387_v40, %s915_s17 }
 0x28d   :  { %v367_v42 = vpop.permute.xlu0 %366 }
 0x28e   :  { %v369_v45 = vmul.f32 %v367_v42, %v357_v31 }
 0x290   :  { %361 = vrot.lane.b32.xlu1 %v359_v41, %s914_s16  ;;  %375 = vrot.lane.b32.xlu0 %v373_v36, %s914_s16 }
 0x294   :  { %553 = vrot.lane.b32.xlu1 %v358_v19, %s915_s17 }
 0x2fe   :  { %v399_v43 = vpop.permute.xlu1 %398  ;;  %v477_v44 = vpop.permute.xlu0 %476 }
 0x2ff   :  { %818 = vmatpush3.xpose.msk.msra.mxu0 %vm49_vm1, %v399_v43  ;;  %823 = vmatpush3.xpose.msk.msra.mxu1 %vm49_vm1, %v477_v44 }
 0x300   :  { %827 = vmatprep.subr.mxu0 %v909_v1  ;;  %832 = vmatprep.subr.mxu1 %v909_v1 }
 0x302   :  { %v362_v46 = vpop.permute.xlu1 %361  ;;  %v376_v47 = vpop.permute.xlu0 %375 }
 0x303   :  { %v364_v48 = vsub.f32 %v359_v41, %v362_v46  ;;  %v378_v49 = vadd.f32 %v376_v47, %v369_v45 }
 0x305   :  { %820 = vmatmul.mubr.msk.f32.vlgmr.msra.gmra.mxu0 %vm49_vm1, %v378_v49  ;;  %825 = vmatmul.mubr.msk.f32.vlgmr.msra.gmra.mxu1 %vm49_vm1, %v364_v48 }
 0x306   :  { %829 = vmatprep.mubr.msk.f32.mxu0 %vm910_vm0, %v909_v1  ;;  %840 = vmatprep.mubr.msk.f32.mxu1 %vm910_vm0, %v909_v1  ;;  %v554_v50 = vpop.permute.xlu1 %553 }
 0x307   :  { %833 = vmatpush3.msra.mxu1 %v649_v0 }
 0x308   :  { %834 = vmatprep.subr.mxu1 %v909_v1 }
 0x309   :  { %835 = vmatpush3.msra.mxu1 %v648_v2 }
 0x30a   :  { %836 = vmatprep.subr.mxu1 %v909_v1 }
 0x30b   :  { %837 = vmatpush3.msra.mxu1 %v647_v3 }
 0x30c   :  { %838 = vmatprep.subr.mxu1 %v909_v1 }
 0x30d   :  { %839 = vmatpush3.msra.mxu1 %v646_v7 }
 0x3c5   :  { %v471_v51 = vpop.f32.mrf.mxu0  ;;  %v549_v52 = vpop.f32.mrf.mxu1 }
 0x3c6   :  { %v550_v53 = vadd.f32 %v549_v52, %v471_v51 }
 0x3c7   :  { %v821_v54 = vpop.f32.mrf.mxu0  ;;  %v826_v55 = vpop.f32.mrf.mxu1 }
 0x3c8   :  { %v556_v56 = vadd.f32 %v554_v50, %v550_v53 }
 0x3ca   :  { %v558_v57 = vsel %vm557_vm4, %v556_v56, -inf }
 0x3cb   :  { %559 = vmax.xlane.f32.xlu0 %v558_v57 }
 0x3e1   :  { %570 = vrot.lane.b32.xlu0 %v357_v31, %s916_s4 }
 0x454   :  { %v560_v58 = vpop.xlane.xlu0 %559 }
 0x455   :  { %v561_v59 = vsub.f32 %v556_v56, %v560_v58 }
 0x457   :  { %v562_v60 = vmul.f32 1.442695, %v561_v59 }
 0x458   :  { %v571_v61 = vpop.permute.xlu0 %570 }
 0x459   :  { %857 = vpow2.f32 %v562_v60  ;;  %828 = vmatpush3.msra.mxu0 %v571_v61 }
 0x466   :  { %v858_v62 = vpop.eup %857 }
 0x467   :  { %v564_v63 = vsel %vm557_vm4, %v858_v62, 0.0 }
 0x468   :  { %565 = vadd.xlane.f32.xlu1 %v564_v63 }
 0x479   :  { %650 = vrot.lane.b32.xlu1 %v747_v26, %s912_s13 }
 0x4f1   :  { %v566_v4 = vpop.xlane.xlu1 %565 }
 0x4f2   :  { %859 = vrcp.f32 %v566_v4 }
 0x4f5   :  { %v651_v10 = vpop.permute.xlu1 %650 }
 0x4ff   :  { %v860_v5 = vpop.eup %859 }
 0x500   :  { %v568_v6 = vmul.f32 %v860_v5, %v858_v62 }
 0x502   :  { %830 = vmatmul.mubr.msk.f32.vlgmr.msra.gmra.mxu0 %vm557_vm4, %v568_v6 }
 0x5c2   :  { %v642_v8 = vpop.f32.mrf.mxu0 }
 0x5c3   :  { %841 = vmatmul.mubr.msk.f32.vlgmr.msra.gmra.mxu1 %vm203_vm3, %v642_v8 }
 0x5c4   :  { %v831_v9 = vpop.f32.mrf.mxu0 }
 0x683   :  { %v722_v11 = vpop.f32.mrf.mxu1 }
 0x684   :  { %v723_v12 = vadd.f32 %v722_v11, %v651_v10 }
 0x685   :  { %v842_v13 = vpop.f32.mrf.mxu1 }
 0x686   :  { %726 = vst.msk [vmem:[#allocation5] sm:$0xff] %vm203_vm3, %v723_v12 }
 0x687   :  { %892 = shalt.err (!%p889_p9)
}
 0x688   :  { %736 = dma.vmem_to_hbm [thread:$0]  %s734_s19, 128, %s1037_s6, [#allocation4]  }
 0x689   :  { %903 = dma.done.wait [#allocation4], 128  }
 0x68a   :  { %904 = vsyncadd [#allocation4], 4294967168 }
 0x68b   :  { %740 = vsyncpa [#allocation3], 1 }
 0x68c   :  { %741 = vsyncpa [#allocation4], 1 }

</bundles_post_ra>
